<compile_context>
chip_gen: v7x
topology: tpu7x:2x2x1
jax: 0.10.0
libtpu: 0.0.40
codegen_flags: <defaults>
</compile_context>

<pallas_src>
import jax
import jax.numpy as jnp
from jax.experimental import pallas as pl
from jax.experimental.pallas import tpu as pltpu


def _round_up(x, m):
    return ((x + m - 1) // m) * m


# ----------------------------------------------------------------------------
# Plain-JAX glue: sampling & grouping (mirrors the PyTorch helpers)
# ----------------------------------------------------------------------------
def square_distance(src, dst):
    # src: [B, N, C], dst: [B, M, C] -> [B, N, M]
    dist = -2.0 * jnp.matmul(src, jnp.swapaxes(dst, 1, 2))
    dist = dist + jnp.sum(src ** 2, -1)[..., None]
    dist = dist + jnp.sum(dst ** 2, -1)[:, None, :]
    return dist


def index_points(points, idx):
    # points: [B, N, C], idx: [B, ...] -> [B, ..., C]
    B = points.shape[0]
    batch = jnp.arange(B).reshape((B,) + (1,) * (idx.ndim - 1))
    return points[batch, idx]


def farthest_point_sample(xyz, npoint, init_farthest):
    # xyz: [B, N, 3]; init_farthest: [B] int32.
    # TODO(synk): torch seeds the initial index with torch.randint, so sampled
    # centroids are not bit-identical to the PyTorch reference.
    B, N, _ = xyz.shape
    batch_idx = jnp.arange(B)

    def body(i, carry):
        centroids, distance, farthest = carry
        centroids = centroids.at[:, i].set(farthest)
        centroid = xyz[batch_idx, farthest][:, None, :]          # [B, 1, 3]
        dist = jnp.sum((xyz - centroid) ** 2, axis=-1)           # [B, N]
        distance = jnp.minimum(distance, dist)
        farthest = jnp.argmax(distance, axis=-1).astype(jnp.int32)
        return centroids, distance, farthest

    carry0 = (jnp.zeros((B, npoint), jnp.int32),
              jnp.full((B, N), 1e10, dtype=xyz.dtype),
              init_farthest.astype(jnp.int32))
    centroids, _, _ = jax.lax.fori_loop(0, npoint, body, carry0)
    return centroids                                             # [B, npoint]


def query_ball_point(radius, nsample, xyz, new_xyz):
    B, N, _ = xyz.shape
    S = new_xyz.shape[1]
    sqrdists = square_distance(new_xyz, xyz)                     # [B, S, N]
    idx = jnp.broadcast_to(jnp.arange(N, dtype=jnp.int32), (B, S, N))
    idx = jnp.where(sqrdists > radius ** 2, N, idx)
    # smallest `nsample` indices in ascending order == sort(...)[..., :nsample]
    group_idx = -jax.lax.top_k(-idx, nsample)[0]
    group_first = jnp.broadcast_to(group_idx[:, :, :1], group_idx.shape)
    group_idx = jnp.where(group_idx == N, group_first, group_idx)
    return group_idx


def sample_and_group(npoint, radius, nsample, xyz, points, init_farthest):
    B, N, C = xyz.shape
    S = npoint
    fps_idx = farthest_point_sample(xyz, npoint, init_farthest)   # [B, S]
    new_xyz = index_points(xyz, fps_idx)                          # [B, S, 3]
    idx = query_ball_point(radius, nsample, xyz, new_xyz)         # [B, S, K]
    grouped_xyz = index_points(xyz, idx)                          # [B, S, K, 3]
    grouped_xyz_norm = grouped_xyz - new_xyz[:, :, None, :]
    if points is not None:
        grouped_points = index_points(points, idx)                # [B, S, K, D]
        new_points = jnp.concatenate([grouped_xyz_norm, grouped_points], axis=-1)
    else:
        new_points = grouped_xyz_norm
    return new_xyz, new_points


def sample_and_group_all(xyz, points):
    B, N, C = xyz.shape
    new_xyz = jnp.zeros((B, 1, C), dtype=xyz.dtype)
    grouped_xyz = xyz[:, None, :, :]
    if points is not None:
        new_points = jnp.concatenate(
            [grouped_xyz, points.reshape(B, 1, N, -1)], axis=-1)
    else:
        new_points = grouped_xyz
    return new_xyz, new_points


# ----------------------------------------------------------------------------
# VMEM / tile sizing (generation aware)
# ----------------------------------------------------------------------------
def _vmem_limit_bytes():
    """~3/4 of physical VMEM, capped at 100 MB.
    v5e/v6e (128 MiB) -> 96 MiB; v7x (64 MiB/TC) -> 48 MiB; unknown -> 48 MiB."""
    cap = None
    try:
        cap = getattr(pltpu.get_tpu_info(), "vmem_capacity_bytes", None)
    except Exception:
        cap = None
    if not cap:
        cap = 64 * 1024 * 1024          # conservative (v7x-sized) default
    return int(min(100 * 2 ** 20, (cap * 3) // 4))


def _pick_group_tile(K, bs, max_cin_plus_cout, max_weight_bytes, vmem_limit):
    """Pick q = groups per tile (whole K-groups, multiple of 8)."""
    budget = (vmem_limit * 3) // 4
    # per-row VMEM: double-buffered bf16 in/out streams + in-kernel f32
    # intermediates (x cast, BN result, f32 matmul acc)  ~ 12 B per channel.
    per_row = 12 * max(max_cin_plus_cout, 1)
    avail = max(budget - max_weight_bytes - (2 << 20), 2 << 20)
    rows_cap = max(int(avail // per_row), 8)
    rows_target = min(rows_cap, 8192)            # amortize ~0.35 us/step overhead
    q = max(1, rows_target // K)
    q = max(8, (q // 8) * 8)                     # whole K-groups, multiple of 8
    # keep enough grid steps for megacore sharding / pipelining on big inputs
    min_tiles = 8
    if bs > min_tiles * 8 and bs // q < min_tiles:
        q = max(8, ((bs // min_tiles) // 8) * 8)
    q = min(q, _round_up(bs, 8))
    return q


# ----------------------------------------------------------------------------
# Pallas kernels
# ----------------------------------------------------------------------------
def _make_layer_kernel(apply_prev_bn, needs_mask, tile_rows, true_rows):
    """Non-last layer pass: [BN+ReLU of previous layer] -> matmul -> write y
    (bf16) + per-tile partial sum / sum-of-squares for this layer's BN."""

    def write_stats(y, sum_ref, sq_ref):
        sum_ref[...] = jnp.sum(y, axis=0).reshape(1, 1, -1)
        sq_ref[...] = jnp.sum(y * y, axis=0).reshape(1, 1, -1)

    def fix_last_tile_stats(y, sum_ref, sq_ref):
        # Padded rows live only in the LAST grid step; redo only its stats.
        @pl.when(pl.program_id(0) == pl.num_programs(0) - 1)
        def _():
            row = (jax.lax.broadcasted_iota(jnp.int32, (tile_rows, 1), 0)
                   + pl.program_id(0) * tile_rows)
            ym = jnp.where(row < true_rows, y, 0.0)
            sum_ref[...] = jnp.sum(ym, axis=0).reshape(1, 1, -1)
            sq_ref[...] = jnp.sum(ym * ym, axis=0).reshape(1, 1, -1)

    if apply_prev_bn:
        def kernel(x_ref, scale_ref, shift_ref, w_ref, y_ref, sum_ref, sq_ref):
            x = x_ref[...].astype(jnp.float32)                         # [T, Cin]
            a = jnp.maximum(x * scale_ref[...] + shift_ref[...], 0.0)  # BN + ReLU
            y = jnp.dot(a.astype(jnp.bfloat16), w_ref[...],
                        preferred_element_type=jnp.float32)            # MXU
            y_ref[...] = y.astype(y_ref.dtype)
            write_stats(y, sum_ref, sq_ref)
            if needs_mask:
                fix_last_tile_stats(y, sum_ref, sq_ref)
    else:
        def kernel(x_ref, w_ref, y_ref, sum_ref, sq_ref):
            # padded input rows are exact zeros -> stats need no masking
            y = jnp.dot(x_ref[...], w_ref[...],
                        preferred_element_type=jnp.float32)            # MXU
            y_ref[...] = y.astype(y_ref.dtype)
            write_stats(y, sum_ref, sq_ref)
    return kernel


def _make_last_layer_kernel(apply_prev_bn, needs_mask, q, K, tile_rows, true_rows):
    """Last layer with the K-axis reduction fused in: matmul -> per-group
    max/min over K (no full-y HBM writeback) + per-tile partial BN stats."""

    def reduce_and_stats(y, gmax_ref, gmin_ref, sum_ref, sq_ref):
        yg = y.reshape(q, K, y.shape[-1])
        gmax_ref[...] = jnp.max(yg, axis=1)
        gmin_ref[...] = jnp.min(yg, axis=1)
        sum_ref[...] = jnp.sum(y, axis=0).reshape(1, 1, -1)
        sq_ref[...] = jnp.sum(y * y, axis=0).reshape(1, 1, -1)
        if needs_mask:
            @pl.when(pl.program_id(0) == pl.num_programs(0) - 1)
            def _():
                row = (jax.lax.broadcasted_iota(jnp.int32, (tile_rows, 1), 0)
                       + pl.program_id(0) * tile_rows)
                ym = jnp.where(row < true_rows, y, 0.0)
                sum_ref[...] = jnp.sum(ym, axis=0).reshape(1, 1, -1)
                sq_ref[...] = jnp.sum(ym * ym, axis=0).reshape(1, 1, -1)

    if apply_prev_bn:
        def kernel(x_ref, scale_ref, shift_ref, w_ref,
                   gmax_ref, gmin_ref, sum_ref, sq_ref):
            x = x_ref[...].astype(jnp.float32)
            a = jnp.maximum(x * scale_ref[...] + shift_ref[...], 0.0)
            y = jnp.dot(a.astype(jnp.bfloat16), w_ref[...],
                        preferred_element_type=jnp.float32)
            reduce_and_stats(y, gmax_ref, gmin_ref, sum_ref, sq_ref)
    else:
        def kernel(x_ref, w_ref, gmax_ref, gmin_ref, sum_ref, sq_ref):
            y = jnp.dot(x_ref[...], w_ref[...], preferred_element_type=jnp.float32)
            reduce_and_stats(y, gmax_ref, gmin_ref, sum_ref, sq_ref)
    return kernel


# ----------------------------------------------------------------------------
# MLP + BN + ReLU + max(K)
# ----------------------------------------------------------------------------
def pointnet_mlp_max(grouped, weights, gammas, betas, eps=1e-5):
    """grouped: [B, S, K, C0] -> [B, S, C_last].  (conv1x1 -> BN -> ReLU)*L -> max(K)."""
    B, S, K, C0 = grouped.shape
    bs = B * S
    L = len(weights)

    # ---- per-layer channel padding ----------------------------------------
    cin_pad0 = _round_up(C0, 8)
    cins, couts = [], []
    last = cin_pad0
    for w in weights:
        _, cout = w.shape
        # Only pad to 128 lanes when cout >= 128; smaller couts stay unpadded
        # (block last dim == full array dim is legal) -> halves the HBM
        # traffic of 16/32/64-channel layers at the cost of masked stores.
        cout_pad = _round_up(cout, 128) if cout >= 128 else _round_up(cout, 8)
        cins.append(last)
        couts.append(cout_pad)
        last = cout_pad

    # ---- generation-aware VMEM budget & tile sizing -------------------------
    vmem_limit = _vmem_limit_bytes()
    max_ch = max(ci + co for ci, co in zip(cins, couts))
    max_w_bytes = 4 * max(ci * co for ci, co in zip(cins, couts))  # 2-buf bf16 weights
    q = _pick_group_tile(K, bs, max_ch, max_w_bytes, vmem_limit)

    bs_pad = _round_up(bs, q)
    n_tiles = bs_pad // q
    tile_rows = q * K
    rows_pad = bs_pad * K
    true_rows = bs * K
    has_pad = rows_pad != true_rows

    # Flatten row-major (group-major, K-minor): free reshape, no HBM transpose.
    x = grouped.reshape(bs, K, C0)
    x = jnp.pad(x, ((0, bs_pad - bs), (0, 0), (0, cin_pad0 - C0)))
    x = x.reshape(rows_pad, cin_pad0).astype(jnp.bfloat16)

    compiler_params = pltpu.CompilerParams(
        dimension_semantics=("parallel",),            # megacore on v7x
        vmem_limit_bytes=vmem_limit)

    scale = shift = None
    gmax = gmin = None
    for li, (w, g, b) in enumerate(zip(weights, gammas, betas)):
        cin, cout = w.shape
        cin_pad, cout_pad = cins[li], couts[li]
        # Conv bias omitted: it cancels exactly under training-mode BatchNorm.
        w_pad = jnp.zeros((cin_pad, cout_pad), jnp.float32)
        w_pad = w_pad.at[:cin, :cout].set(w).astype(jnp.bfloat16)

        apply_prev = li > 0
        is_last = li == L - 1
        needs_mask = apply_prev and has_pad

        in_specs = [pl.BlockSpec((tile_rows, cin_pad), lambda i: (i, 0))]
        args = [x]
        if apply_prev:
            in_specs += [pl.BlockSpec((1, cin_pad), lambda i: (0, 0)),
                         pl.BlockSpec((1, cin_pad), lambda i: (0, 0))]
            args += [scale, shift]
        # Grid-invariant operands (weight / scale / shift) stay VMEM resident.
        # TODO(synk): pipeline_mode=pl.Buffered(1) on these would save a little
        # VMEM; skipped to keep the pipelining path identical to the validated one.
        in_specs += [pl.BlockSpec((cin_pad, cout_pad), lambda i: (0, 0))]
        args += [w_pad]

        flops = 2 * rows_pad * cin_pad * cout_pad

        if is_last:
            kernel = _make_last_layer_kernel(apply_prev, needs_mask, q, K,
                                             tile_rows, true_rows)
            out_shape = (
                jax.ShapeDtypeStruct((bs_pad, cout_pad), jnp.float32),   # group max
                jax.ShapeDtypeStruct((bs_pad, cout_pad), jnp.float32),   # group min
                jax.ShapeDtypeStruct((n_tiles, 1, cout_pad), jnp.float32),
                jax.ShapeDtypeStruct((n_tiles, 1, cout_pad), jnp.float32),
            )
            out_specs = (
                pl.BlockSpec((q, cout_pad), lambda i: (i, 0)),
                pl.BlockSpec((q, cout_pad), lambda i: (i, 0)),
                pl.BlockSpec((1, 1, cout_pad), lambda i: (i, 0, 0)),
                pl.BlockSpec((1, 1, cout_pad), lambda i: (i, 0, 0)),
            )
            bytes_accessed = (rows_pad * cin_pad * 2 + cin_pad * cout_pad * 2
                              + 2 * bs_pad * cout_pad * 4
                              + 2 * n_tiles * cout_pad * 4)
            gmax, gmin, psum, psq = pl.pallas_call(
                kernel, grid=(n_tiles,), in_specs=in_specs, out_specs=out_specs,
                out_shape=out_shape, compiler_params=compiler_params,
                cost_estimate=pl.CostEstimate(flops=flops, transcendentals=0,
                                              bytes_accessed=bytes_accessed),
            )(*args)
        else:
            kernel = _make_layer_kernel(apply_prev, needs_mask, tile_rows, true_rows)
            out_shape = (
                jax.ShapeDtypeStruct((rows_pad, cout_pad), jnp.bfloat16),
                jax.ShapeDtypeStruct((n_tiles, 1, cout_pad), jnp.float32),
                jax.ShapeDtypeStruct((n_tiles, 1, cout_pad), jnp.float32),
            )
            out_specs = (
                pl.BlockSpec((tile_rows, cout_pad), lambda i: (i, 0)),
                pl.BlockSpec((1, 1, cout_pad), lambda i: (i, 0, 0)),
                pl.BlockSpec((1, 1, cout_pad), lambda i: (i, 0, 0)),
            )
            bytes_accessed = (rows_pad * cin_pad * 2 + rows_pad * cout_pad * 2
                              + cin_pad * cout_pad * 2 + 2 * n_tiles * cout_pad * 4)
            x, psum, psq = pl.pallas_call(
                kernel, grid=(n_tiles,), in_specs=in_specs, out_specs=out_specs,
                out_shape=out_shape, compiler_params=compiler_params,
                cost_estimate=pl.CostEstimate(flops=flops, transcendentals=0,
                                              bytes_accessed=bytes_accessed),
            )(*args)

        # Tiny JAX-side reduction of per-tile partial stats (single-pass var,
        # f32), folded with gamma/beta into per-channel (scale, shift).
        total = jnp.sum(psum, axis=(0, 1))                       # [cout_pad]
        total_sq = jnp.sum(psq, axis=(0, 1))
        mean = total / true_rows
        var = jnp.maximum(total_sq / true_rows - mean * mean, 0.0)
        inv = jax.lax.rsqrt(var + eps)
        g_pad = jnp.zeros((cout_pad,), jnp.float32).at[:cout].set(g)
        b_pad = jnp.zeros((cout_pad,), jnp.float32).at[:cout].set(b)
        scale = (g_pad * inv).reshape(1, cout_pad)
        shift = (b_pad - mean * g_pad * inv).reshape(1, cout_pad)

    # Final BN + ReLU + K-max is now a tiny per-group elementwise op (the K
    # reduction was fused into the last kernel).  For a monotone ReLU:
    #   max_k ReLU(s*y_k + t) = ReLU(s*max_k(y_k) + t)  if s >= 0
    #                         = ReLU(s*min_k(y_k) + t)  if s <  0   (neg. gamma)
    sc = scale.reshape(-1)
    sh = shift.reshape(-1)
    picked = jnp.where(sc >= 0.0, gmax, gmin)                    # [bs_pad, cout_pad]
    out = jnp.maximum(picked * sc + sh, 0.0)

    c_last = weights[-1].shape[1]
    return out[:bs, :c_last].reshape(B, S, c_last)


# ----------------------------------------------------------------------------
# Module wrapper
# ----------------------------------------------------------------------------
class PointNetSetAbstractionPallas:
    def __init__(self, npoint, radius, nsample, in_channel, mlp, group_all,
                 key=None):
        if key is None:
            key = jax.random.PRNGKey(42)
        self.npoint = npoint
        self.radius = radius
        self.nsample = nsample
        self.group_all = group_all
        self.weights, self.gammas, self.betas = [], [], []
        last = in_channel
        for i, out_c in enumerate(mlp):
            kw, _ = jax.random.split(jax.random.fold_in(key, i))
            bound = 1.0 / float(last) ** 0.5
            # Conv2d(last, out_c, 1): weight as matmul [last, out_c].
            # NOTE: conv bias is omitted — it cancels exactly under
            # training-mode BatchNorm (absorbed into the batch mean).
            w = jax.random.uniform(kw, (last, out_c), jnp.float32, -bound, bound)
            self.weights.append(w)
            self.gammas.append(jnp.ones((out_c,), jnp.float32))   # BN default
            self.betas.append(jnp.zeros((out_c,), jnp.float32))
            last = out_c
        # TODO(synk): BatchNorm running mean/var are not tracked, so only the
        # training-mode forward matches PyTorch (eval mode would diverge).

    def __call__(self, xyz, points, fps_key=None):
        """xyz: [B, 3, N], points: [B, D, N] or None.
        Returns new_xyz [B, 3, S], new_points [B, C_last, S]."""
        if fps_key is None:
            fps_key = jax.random.PRNGKey(1)
        xyz_t = jnp.transpose(xyz, (0, 2, 1))                    # [B, N, 3]
        points_t = None if points is None else jnp.transpose(points, (0, 2, 1))
        B, N, _ = xyz_t.shape
        if self.group_all:
            new_xyz, new_points = sample_and_group_all(xyz_t, points_t)
        else:
            init_far = jax.random.randint(fps_key, (B,), 0, N)
            new_xyz, new_points = sample_and_group(
                self.npoint, self.radius, self.nsample, xyz_t, points_t, init_far)
        # new_points: [B, S, K, C_in]; MLP + BN + ReLU + max(K) in Pallas
        feat = pointnet_mlp_max(new_points, self.weights,
                                self.gammas, self.betas)          # [B, S, C_last]
        new_xyz_out = jnp.transpose(new_xyz, (0, 2, 1))           # [B, 3, S]
        new_points_out = jnp.transpose(feat, (0, 2, 1))           # [B, C_last, S]
        return new_xyz_out, new_points_out


# ----------------------------------------------------------------------------
if __name__ == "__main__":
    key = jax.random.PRNGKey(0)
    k_xyz, k_pts, k_fps = jax.random.split(key, 3)

    B, N, D = 2, 16, 4
    npoint, radius, nsample = 4, 0.8, 8
    in_channel = 3 + D
    mlp = [16, 32]

    xyz = jax.random.normal(k_xyz, (B, 3, N), jnp.float32)
    points = jax.random.normal(k_pts, (B, D, N), jnp.float32)

    sa = PointNetSetAbstractionPallas(npoint, radius, nsample, in_channel, mlp,
                                      group_all=False)

    fwd = jax.jit(lambda a, b, k: sa(a, b, fps_key=k))
    new_xyz, new_points = fwd(xyz, points, k_fps)
    jax.block_until_ready((new_xyz, new_points))

    assert new_xyz.shape == (B, 3, npoint)
    assert new_points.shape == (B, mlp[-1], npoint)
    assert bool(jnp.all(jnp.isfinite(new_points)))
    print("KERNEL_OK")
</pallas_src>

<mosaic_0001>
module attributes {stable_mosaic.version = 11 : i64} {
  func.func @kernel(%arg0: i32, %arg1: memref<64x16xbf16, #tpu.memory_space<vmem>>, %arg2: memref<1x16xf32, #tpu.memory_space<vmem>>, %arg3: memref<1x16xf32, #tpu.memory_space<vmem>>, %arg4: memref<16x32xbf16, #tpu.memory_space<vmem>>, %arg5: memref<8x32xf32, #tpu.memory_space<vmem>>, %arg6: memref<8x32xf32, #tpu.memory_space<vmem>>, %arg7: memref<1x1x32xf32, #tpu.memory_space<vmem>>, %arg8: memref<1x1x32xf32, #tpu.memory_space<vmem>>) attributes {dimension_semantics = [#tpu.dimension_semantics<parallel>], iteration_bounds = array<i64: 1>, scalar_prefetch = 0 : i64, scratch_operands = 0 : i64, tpu.core_type = #tpu.core_type<tc>, window_params = [{transform_indices = @transform_0, window_bounds = array<i64: 64, 16>}, {pipeline_mode = #tpu.pipeline_mode<synchronous>, transform_indices = @transform_1, window_bounds = array<i64: 1, 16>}, {pipeline_mode = #tpu.pipeline_mode<synchronous>, transform_indices = @transform_2, window_bounds = array<i64: 1, 16>}, {pipeline_mode = #tpu.pipeline_mode<synchronous>, transform_indices = @transform_3, window_bounds = array<i64: 16, 32>}, {transform_indices = @transform_4, window_bounds = array<i64: 8, 32>}, {transform_indices = @transform_5, window_bounds = array<i64: 8, 32>}, {transform_indices = @transform_6, window_bounds = array<i64: 1, 1, 32>}, {transform_indices = @transform_7, window_bounds = array<i64: 1, 1, 32>}]} {
    %c0 = arith.constant 0 : index
    %c0_0 = arith.constant 0 : index
    %0 = vector.load %arg1[%c0, %c0_0] : memref<64x16xbf16, #tpu.memory_space<vmem>>, vector<64x16xbf16>
    %1 = arith.extf %0 : vector<64x16xbf16> to vector<64x16xf32>
    %c0_1 = arith.constant 0 : index
    %c0_2 = arith.constant 0 : index
    %2 = vector.load %arg2[%c0_1, %c0_2] : memref<1x16xf32, #tpu.memory_space<vmem>>, vector<1x16xf32>
    %3 = vector.broadcast %2 : vector<1x16xf32> to vector<64x16xf32>
    %4 = arith.mulf %1, %3 : vector<64x16xf32>
    %c0_3 = arith.constant 0 : index
    %c0_4 = arith.constant 0 : index
    %5 = vector.load %arg3[%c0_3, %c0_4] : memref<1x16xf32, #tpu.memory_space<vmem>>, vector<1x16xf32>
    %6 = vector.broadcast %5 : vector<1x16xf32> to vector<64x16xf32>
    %7 = arith.addf %4, %6 : vector<64x16xf32>
    %cst = arith.constant 0.000000e+00 : f32
    %8 = vector.broadcast %cst : f32 to vector<64x16xf32>
    %9 = arith.maximumf %7, %8 : vector<64x16xf32>
    %10 = arith.truncf %9 : vector<64x16xf32> to vector<64x16xbf16>
    %c0_5 = arith.constant 0 : index
    %c0_6 = arith.constant 0 : index
    %11 = vector.load %arg4[%c0_5, %c0_6] : memref<16x32xbf16, #tpu.memory_space<vmem>>, vector<16x32xbf16>
    %cst_7 = arith.constant dense<0.000000e+00> : vector<64x32xf32>
    %12 = tpu.matmul %10, %11, %cst_7 {dimension_numbers = #tpu.dot_dimension_numbers<[1], [0], [0], [1], [0, 0, 1, 1], [], []>} : vector<64x16xbf16>, vector<16x32xbf16>, vector<64x32xf32> -> vector<64x32xf32>
    %13 = vector.shape_cast %12 : vector<64x32xf32> to vector<8x8x32xf32>
    %cst_8 = arith.constant dense<0xFF800000> : vector<8x32xf32>
    %14 = vector.multi_reduction <maximumf>, %13, %cst_8 [1] : vector<8x8x32xf32> to vector<8x32xf32>
    %c0_9 = arith.constant 0 : index
    %c0_10 = arith.constant 0 : index
    %15 = vector.load %arg5[%c0_9, %c0_10] : memref<8x32xf32, #tpu.memory_space<vmem>>, vector<8x32xf32>
    tpu.vector_store %arg5[%c0_9, %c0_10], %14 {strides = array<i32>} : memref<8x32xf32, #tpu.memory_space<vmem>>, vector<8x32xf32>,
    %cst_11 = arith.constant dense<0x7F800000> : vector<8x32xf32>
    %16 = vector.multi_reduction <minimumf>, %13, %cst_11 [1] : vector<8x8x32xf32> to vector<8x32xf32>
    %c0_12 = arith.constant 0 : index
    %c0_13 = arith.constant 0 : index
    %17 = vector.load %arg6[%c0_12, %c0_13] : memref<8x32xf32, #tpu.memory_space<vmem>>, vector<8x32xf32>
    tpu.vector_store %arg6[%c0_12, %c0_13], %16 {strides = array<i32>} : memref<8x32xf32, #tpu.memory_space<vmem>>, vector<8x32xf32>,
    %cst_14 = arith.constant dense<0.000000e+00> : vector<32xf32>
    %18 = vector.multi_reduction <add>, %12, %cst_14 [0] : vector<64x32xf32> to vector<32xf32>
    %19 = vector.shape_cast %18 : vector<32xf32> to vector<1x1x32xf32>
    %c0_15 = arith.constant 0 : index
    %c0_16 = arith.constant 0 : index
    %c0_17 = arith.constant 0 : index
    %20 = vector.load %arg7[%c0_15, %c0_16, %c0_17] : memref<1x1x32xf32, #tpu.memory_space<vmem>>, vector<1x1x32xf32>
    tpu.vector_store %arg7[%c0_15, %c0_16, %c0_17], %19 {strides = array<i32>} : memref<1x1x32xf32, #tpu.memory_space<vmem>>, vector<1x1x32xf32>,
    %21 = arith.mulf %12, %12 : vector<64x32xf32>
    %cst_18 = arith.constant dense<0.000000e+00> : vector<32xf32>
    %22 = vector.multi_reduction <add>, %21, %cst_18 [0] : vector<64x32xf32> to vector<32xf32>
    %23 = vector.shape_cast %22 : vector<32xf32> to vector<1x1x32xf32>
    %c0_19 = arith.constant 0 : index
    %c0_20 = arith.constant 0 : index
    %c0_21 = arith.constant 0 : index
    %24 = vector.load %arg8[%c0_19, %c0_20, %c0_21] : memref<1x1x32xf32, #tpu.memory_space<vmem>>, vector<1x1x32xf32>
    tpu.vector_store %arg8[%c0_19, %c0_20, %c0_21], %23 {strides = array<i32>} : memref<1x1x32xf32, #tpu.memory_space<vmem>>, vector<1x1x32xf32>,
    return
  }
  func.func @transform_0(%arg0: i32) -> (i32, i32) {
    %c0_i32 = arith.constant 0 : i32
    %c0_i32_0 = arith.constant 0 : i32
    return %arg0, %c0_i32 : i32, i32
  }
  func.func @transform_1(%arg0: i32) -> (i32, i32) {
    %c0_i32 = arith.constant 0 : i32
    %c0_i32_0 = arith.constant 0 : i32
    %c0_i32_1 = arith.constant 0 : i32
    return %c0_i32, %c0_i32_0 : i32, i32
  }
  func.func @transform_2(%arg0: i32) -> (i32, i32) {
    %c0_i32 = arith.constant 0 : i32
    %c0_i32_0 = arith.constant 0 : i32
    %c0_i32_1 = arith.constant 0 : i32
    return %c0_i32, %c0_i32_0 : i32, i32
  }
  func.func @transform_3(%arg0: i32) -> (i32, i32) {
    %c0_i32 = arith.constant 0 : i32
    %c0_i32_0 = arith.constant 0 : i32
    %c0_i32_1 = arith.constant 0 : i32
    return %c0_i32, %c0_i32_0 : i32, i32
  }
  func.func @transform_4(%arg0: i32) -> (i32, i32) {
    %c0_i32 = arith.constant 0 : i32
    %c0_i32_0 = arith.constant 0 : i32
    return %arg0, %c0_i32 : i32, i32
  }
  func.func @transform_5(%arg0: i32) -> (i32, i32) {
    %c0_i32 = arith.constant 0 : i32
    %c0_i32_0 = arith.constant 0 : i32
    return %arg0, %c0_i32 : i32, i32
  }
  func.func @transform_6(%arg0: i32) -> (i32, i32, i32) {
    %c0_i32 = arith.constant 0 : i32
    %c0_i32_0 = arith.constant 0 : i32
    %c0_i32_1 = arith.constant 0 : i32
    return %arg0, %c0_i32, %c0_i32_0 : i32, i32, i32
  }
  func.func @transform_7(%arg0: i32) -> (i32, i32, i32) {
    %c0_i32 = arith.constant 0 : i32
    %c0_i32_0 = arith.constant 0 : i32
    %c0_i32_1 = arith.constant 0 : i32
    return %arg0, %c0_i32, %c0_i32_0 : i32, i32, i32
  }
}

module attributes {stable_mosaic.version = 11 : i64} {
  func.func @kernel(%arg0: i32, %arg1: memref<64x8xbf16, #tpu.memory_space<vmem>>, %arg2: memref<8x16xbf16, #tpu.memory_space<vmem>>, %arg3: memref<64x16xbf16, #tpu.memory_space<vmem>>, %arg4: memref<1x1x16xf32, #tpu.memory_space<vmem>>, %arg5: memref<1x1x16xf32, #tpu.memory_space<vmem>>) attributes {dimension_semantics = [#tpu.dimension_semantics<parallel>], iteration_bounds = array<i64: 1>, scalar_prefetch = 0 : i64, scratch_operands = 0 : i64, tpu.core_type = #tpu.core_type<tc>, window_params = [{transform_indices = @transform_0, window_bounds = array<i64: 64, 8>}, {pipeline_mode = #tpu.pipeline_mode<synchronous>, transform_indices = @transform_1, window_bounds = array<i64: 8, 16>}, {transform_indices = @transform_2, window_bounds = array<i64: 64, 16>}, {transform_indices = @transform_3, window_bounds = array<i64: 1, 1, 16>}, {transform_indices = @transform_4, window_bounds = array<i64: 1, 1, 16>}]} {
    %c0 = arith.constant 0 : index
    %c0_0 = arith.constant 0 : index
    %0 = vector.load %arg1[%c0, %c0_0] : memref<64x8xbf16, #tpu.memory_space<vmem>>, vector<64x8xbf16>
    %c0_1 = arith.constant 0 : index
    %c0_2 = arith.constant 0 : index
    %1 = vector.load %arg2[%c0_1, %c0_2] : memref<8x16xbf16, #tpu.memory_space<vmem>>, vector<8x16xbf16>
    %cst = arith.constant dense<0.000000e+00> : vector<64x16xf32>
    %2 = tpu.matmul %0, %1, %cst {dimension_numbers = #tpu.dot_dimension_numbers<[1], [0], [0], [1], [0, 0, 1, 1], [], []>} : vector<64x8xbf16>, vector<8x16xbf16>, vector<64x16xf32> -> vector<64x16xf32>
    %3 = arith.truncf %2 : vector<64x16xf32> to vector<64x16xbf16>
    %c0_3 = arith.constant 0 : index
    %c0_4 = arith.constant 0 : index
    %4 = vector.load %arg3[%c0_3, %c0_4] : memref<64x16xbf16, #tpu.memory_space<vmem>>, vector<64x16xbf16>
    tpu.vector_store %arg3[%c0_3, %c0_4], %3 {strides = array<i32>} : memref<64x16xbf16, #tpu.memory_space<vmem>>, vector<64x16xbf16>,
    %cst_5 = arith.constant dense<0.000000e+00> : vector<16xf32>
    %5 = vector.multi_reduction <add>, %2, %cst_5 [0] : vector<64x16xf32> to vector<16xf32>
    %6 = vector.shape_cast %5 : vector<16xf32> to vector<1x1x16xf32>
    %c0_6 = arith.constant 0 : index
    %c0_7 = arith.constant 0 : index
    %c0_8 = arith.constant 0 : index
    %7 = vector.load %arg4[%c0_6, %c0_7, %c0_8] : memref<1x1x16xf32, #tpu.memory_space<vmem>>, vector<1x1x16xf32>
    tpu.vector_store %arg4[%c0_6, %c0_7, %c0_8], %6 {strides = array<i32>} : memref<1x1x16xf32, #tpu.memory_space<vmem>>, vector<1x1x16xf32>,
    %8 = arith.mulf %2, %2 : vector<64x16xf32>
    %cst_9 = arith.constant dense<0.000000e+00> : vector<16xf32>
    %9 = vector.multi_reduction <add>, %8, %cst_9 [0] : vector<64x16xf32> to vector<16xf32>
    %10 = vector.shape_cast %9 : vector<16xf32> to vector<1x1x16xf32>
    %c0_10 = arith.constant 0 : index
    %c0_11 = arith.constant 0 : index
    %c0_12 = arith.constant 0 : index
    %11 = vector.load %arg5[%c0_10, %c0_11, %c0_12] : memref<1x1x16xf32, #tpu.memory_space<vmem>>, vector<1x1x16xf32>
    tpu.vector_store %arg5[%c0_10, %c0_11, %c0_12], %10 {strides = array<i32>} : memref<1x1x16xf32, #tpu.memory_space<vmem>>, vector<1x1x16xf32>,
    return
  }
  func.func @transform_0(%arg0: i32) -> (i32, i32) {
    %c0_i32 = arith.constant 0 : i32
    %c0_i32_0 = arith.constant 0 : i32
    return %arg0, %c0_i32 : i32, i32
  }
  func.func @transform_1(%arg0: i32) -> (i32, i32) {
    %c0_i32 = arith.constant 0 : i32
    %c0_i32_0 = arith.constant 0 : i32
    %c0_i32_1 = arith.constant 0 : i32
    return %c0_i32, %c0_i32_0 : i32, i32
  }
  func.func @transform_2(%arg0: i32) -> (i32, i32) {
    %c0_i32 = arith.constant 0 : i32
    %c0_i32_0 = arith.constant 0 : i32
    return %arg0, %c0_i32 : i32, i32
  }
  func.func @transform_3(%arg0: i32) -> (i32, i32, i32) {
    %c0_i32 = arith.constant 0 : i32
    %c0_i32_0 = arith.constant 0 : i32
    %c0_i32_1 = arith.constant 0 : i32
    return %arg0, %c0_i32, %c0_i32_0 : i32, i32, i32
  }
  func.func @transform_4(%arg0: i32) -> (i32, i32, i32) {
    %c0_i32 = arith.constant 0 : i32
    %c0_i32_0 = arith.constant 0 : i32
    %c0_i32_1 = arith.constant 0 : i32
    return %arg0, %c0_i32, %c0_i32_0 : i32, i32, i32
  }
}

</mosaic_0001>

<bundles_post_ra>
// kernel: custom-call.8
= control target key start
LH: loop header
LB: loop body
LE: loop exit
PB: predicated region body
PF: predicated region fallthrough
CT: control target
= control target key end

     0   :  { %s6_s0 = inlined_call_operand.vmem [shape: f32[2,16], index: 0, kind: output, shape index: {}]  }

// kernel: _lambda_.3
= control target key start
LH: loop header
LB: loop body
LE: loop exit
PB: predicated region body
PF: predicated region fallthrough
CT: control target
= control target key end

     0   :  { %vm88_vm0 = vcmask 130048   ;;  %vm166_vm1 = vcmask 261120   ;;  %vm231_vm2 = vcmask 1041409   ;;  %vm233_vm3 = vcmask 1042434   ;;  %s641_s3 = inlined_call_operand.vmem [shape: bf16[16,32], index: 3, kind: input, shape index: {}]   ;;  %s642_s0 = inlined_call_operand.vmem [shape: bf16[64,16], index: 0, kind: input, shape index: {}]   ;;  %s643_s1 = inlined_call_operand.vmem [shape: f32[1,16], index: 1, kind: input, shape index: {}]   ;;  %s644_s2 = inlined_call_operand.vmem [shape: f32[1,16], index: 2, kind: input, shape index: {}]   ;;  %s645_s4 = inlined_call_operand.vmem [shape: f32[8,32], index: 4, kind: output, shape index: {0}]   ;;  %s646_s5 = inlined_call_operand.vmem [shape: f32[8,32], index: 5, kind: output, shape index: {1}]   ;;  %s647_s6 = inlined_call_operand.vmem [shape: f32[1,1,32], index: 6, kind: output, shape index: {2}]   ;;  %s648_s7 = inlined_call_operand.vmem [shape: f32[1,1,32], index: 7, kind: output, shape index: {3}]  }
   0x1   :  { %v432_v0 = vld [vmem:[%s641_s3] sm:$0xff]   ;;  %v413_v5 = vld [vmem:[%s642_s0 + $0x10] sm:$0xff]   ;;  %v412_v6 = vld [vmem:[%s642_s0 + $0x8] sm:$0xff]   ;;  %vm235_vm4 = vcmask 1043459   ;;  %vm237_vm5 = vcmask 1044484   ;;  %vm239_vm6 = vcmask 1045509  }
   0x2   :  { %v397_v1 = vld [vmem:[%s642_s0] sm:$0xff]   ;;  %420 = vmatprep.subr.bf16.mxu0 %v432_v0  ;;  %430 = vmatprep.subr.bf16.mxu1 %v432_v0  ;;  %v414_v7 = vld [vmem:[%s642_s0 + $0x18] sm:$0xff]   ;;  %v406_v9 = vunpack.c.l.bf16 %v413_v5  ;;  %v407_v10 = vunpack.c.h.bf16 %v413_v5  ;;  %v402_v11 = vunpack.c.l.bf16 %v412_v6  ;;  %v403_v12 = vunpack.c.h.bf16 %v412_v6 }
   0x3   :  { %v389_v2 = vld [vmem:[%s643_s1] ss:$0 sm:$0xff]  ;;  %v398_v3 = vunpack.c.l.bf16 %v397_v1  ;;  %v399_v4 = vunpack.c.h.bf16 %v397_v1  ;;  %421 = vmatpush3.bf16.msra.mxu0 %v432_v0  ;;  %431 = vmatpush3.bf16.msra.mxu1 %v432_v0  ;;  %v410_v15 = vunpack.c.l.bf16 %v414_v7  ;;  %v411_v16 = vunpack.c.h.bf16 %v414_v7 }
   0x4   :  { %v390_v8 = vld [vmem:[%s644_s2] ss:$0 sm:$0xff]  ;;  %v49_v17 = vmul.f32 %v406_v9, %v389_v2  ;;  %v50_v18 = vmul.f32 %v407_v10, %v389_v2  ;;  %v47_v19 = vmul.f32 %v402_v11, %v389_v2  ;;  %v48_v20 = vmul.f32 %v403_v12, %v389_v2 }
   0x5   :  { %v45_v13 = vmul.f32 %v398_v3, %v389_v2  ;;  %v46_v14 = vmul.f32 %v399_v4, %v389_v2  ;;  %v51_v23 = vmul.f32 %v410_v15, %v389_v2  ;;  %v52_v24 = vmul.f32 %v411_v16, %v389_v2 }
   0x6   :  { %v64_v25 = vadd.f32 %v390_v8, %v49_v17  ;;  %v65_v26 = vadd.f32 %v390_v8, %v50_v18  ;;  %v62_v27 = vadd.f32 %v390_v8, %v47_v19  ;;  %v63_v28 = vadd.f32 %v390_v8, %v48_v20 }
   0x7   :  { %v60_v21 = vadd.f32 %v390_v8, %v45_v13  ;;  %v61_v22 = vadd.f32 %v390_v8, %v46_v14  ;;  %v66_v31 = vadd.f32 %v390_v8, %v51_v23  ;;  %v67_v32 = vadd.f32 %v390_v8, %v52_v24 }
   0x8   :  { %v72_v33 = vmax.f32 %v64_v25, 0.0  ;;  %v73_v34 = vmax.f32 %v65_v26, 0.0  ;;  %v70_v35 = vmax.f32 %v62_v27, 0.0  ;;  %v71_v36 = vmax.f32 %v63_v28, 0.0 }
   0x9   :  { %v68_v29 = vmax.f32 %v60_v21, 0.0  ;;  %v69_v30 = vmax.f32 %v61_v22, 0.0  ;;  %v74_v38 = vmax.f32 %v66_v31, 0.0  ;;  %v75_v39 = vmax.f32 %v67_v32, 0.0 }
   0xa   :  { %v78_v40 = vpack.c.bf16 %v73_v34, %v72_v33  ;;  %v77_v41 = vpack.c.bf16 %v71_v36, %v70_v35  ;;  %vm241_vm7 = vcmask 1046534   ;;  %vm243_vm8 = vcmask 1047559  }
   0xb   :  { %v76_v37 = vpack.c.bf16 %v69_v30, %v68_v29  ;;  %v79_v42 = vpack.c.bf16 %v75_v39, %v74_v38  ;;  %vm341_vm9 = vcmask 253952  }
   0xc   :  { %426 = vmatprep.mubr.msk.bf16.mxu1 %vm88_vm0, %v78_v40 }
   0xd   :  { %422 = vmatprep.mubr.msk.bf16.mxu0 %vm88_vm0, %v76_v37  ;;  %427 = vmatmul.mubr.msk.bf16.vlgmr.msra.gmra.mrb[0].mxu1 %vm88_vm0, %v79_v42 }
   0xe   :  { %423 = vmatmul.mubr.msk.bf16.vlgmr.msra.gmra.mrb[0].mxu0 %vm88_vm0, %v77_v41 }
  0xe0   :  { %v428_v46 = vpop.f32.mrb[0].mxu1 }
  0xe1   :  { %v424_v43 = vpop.f32.mrb[0].mxu0  ;;  %v209_v50 = vsel %vm166_vm1, %v428_v46, -inf  ;;  %v289_v51 = vsel %vm166_vm1, %v428_v46, inf  ;;  %v151_v52 = vpop.f32.mrb[1].mxu1  ;;  %v349_v16 = vmul.f32 %v428_v46, %v428_v46  ;;  %v529_v28 = vsel %vm166_vm1, %v428_v46, 0.0 }
  0xe2   :  { %v181_v44 = vsel %vm166_vm1, %v424_v43, -inf  ;;  %v261_v45 = vsel %vm166_vm1, %v424_v43, inf  ;;  %v500_v47 = vpop.f32.mrb[1].mxu0  ;;  %v210_v54 = vrot.slane %v209_v50, 4  ;;  %v290_v55 = vrot.slane %v289_v51, 4  ;;  %v506_v56 = vpop.f32.mrb[2].mxu1 }
  0xe3   :  { %v182_v48 = vrot.slane %v181_v44, 4  ;;  %v262_v49 = vrot.slane %v261_v45, 4  ;;  %v504_v53 = vpop.f32.mrb[2].mxu0  ;;  %v167_v60 = vsel %vm166_vm1, %v500_v47, -inf  ;;  %v512_v61 = vpop.f32.mrb[3].mxu1  ;;  %v247_v1 = vsel %vm166_vm1, %v500_v47, inf }
  0xe4   :  { %v508_v57 = vpop.f32.mrb[3].mxu0  ;;  %v211_v62 = vmax.f32 %v209_v50, %v210_v54  ;;  %v291_v63 = vmin.f32 %v289_v51, %v290_v55  ;;  %v168_v0 = vrot.slane %v167_v60, 4  ;;  %v248_v4 = vrot.slane %v247_v1, 4 }
  0xe5   :  { %v183_v58 = vmax.f32 %v181_v44, %v182_v48  ;;  %v263_v59 = vmin.f32 %v261_v45, %v262_v49  ;;  %v345_v8 = vmul.f32 %v424_v43, %v424_v43  ;;  %v195_v10 = vsel %vm166_vm1, %v151_v52, -inf }
  0xe6   :  { %v212_v5 = vrot.slane %v211_v62, 2  ;;  %v292_v6 = vrot.slane %v291_v63, 2  ;;  %v169_v7 = vmax.f32 %v167_v60, %v168_v0  ;;  %v249_v9 = vmin.f32 %v247_v1, %v248_v4 }
  0xe7   :  { %v184_v2 = vrot.slane %v183_v58, 2  ;;  %v264_v3 = vrot.slane %v263_v59, 2  ;;  %v196_v14 = vrot.slane %v195_v10, 4  ;;  %v275_v18 = vsel %vm166_vm1, %v151_v52, inf }
  0xe8   :  { %v170_v13 = vrot.slane %v169_v7, 2  ;;  %v517_v15 = vmax.f32 %v211_v62, %v212_v5  ;;  %v250_v17 = vrot.slane %v249_v9, 2  ;;  %v520_v19 = vmin.f32 %v291_v63, %v292_v6 }
  0xe9   :  { %v185_v11 = vmax.f32 %v183_v58, %v184_v2  ;;  %v265_v12 = vmin.f32 %v263_v59, %v264_v3  ;;  %v197_v21 = vmax.f32 %v195_v10, %v196_v14  ;;  %v523_v22 = vsel %vm166_vm1, %v424_v43, 0.0 }
  0xea   :  { %v171_v20 = vmax.f32 %v169_v7, %v170_v13  ;;  %v526_v23 = vsel %vm166_vm1, %v345_v8, 0.0  ;;  %v251_v24 = vmin.f32 %v249_v9, %v250_v17  ;;  %v276_v25 = vrot.slane %v275_v18, 4 }
  0xeb   :  { %v186_v26 = vrot.slane %v185_v11, 1  ;;  %v266_v27 = vrot.slane %v265_v12, 1  ;;  %v198_v29 = vrot.slane %v197_v21, 2  ;;  %v214_v30 = vrot.slane %v517_v15, 1 }
  0xec   :  { %v533_v31 = vsel %vm166_vm1, %v349_v16, 0.0  ;;  %v537_v32 = vmul.f32 %v500_v47, %v500_v47  ;;  %v277_v33 = vmin.f32 %v275_v18, %v276_v25  ;;  %v294_v34 = vrot.slane %v520_v19, 1 }
  0xed   :  { %v172_v35 = vrot.slane %v171_v20, 1  ;;  %v188_v36 = vsel %vm166_vm1, %v504_v53, -inf  ;;  %v268_v37 = vsel %vm166_vm1, %v504_v53, inf  ;;  %v252_v38 = vrot.slane %v251_v24, 1 }
  0xee   :  { %v199_v39 = vmax.f32 %v197_v21, %v198_v29  ;;  %v278_v40 = vrot.slane %v277_v33, 2  ;;  %v189_v41 = vrot.slane %v188_v36, 4  ;;  %v544_v42 = vmax.f32 %v185_v11, %v186_v26 }
  0xef   :  { %v546_v43 = vmin.f32 %v265_v12, %v266_v27  ;;  %v549_v44 = vsel %vm166_vm1, %v151_v52, 0.0  ;;  %v269_v45 = vrot.slane %v268_v37, 4  ;;  %v347_v46 = vmul.f32 %v151_v52, %v151_v52 }
  0xf0   :  { %v190_v48 = vmax.f32 %v188_v36, %v189_v41  ;;  %v216_v49 = vsel %vm166_vm1, %v506_v56, -inf  ;;  %v296_v50 = vsel %vm166_vm1, %v506_v56, inf  ;;  %v555_v51 = vmax.f32 %v171_v20, %v172_v35 }
  0xf1   :  { %v279_v54 = vmin.f32 %v277_v33, %v278_v40  ;;  %v270_v55 = vmin.f32 %v268_v37, %v269_v45  ;;  %v217_v58 = vrot.slane %v216_v49, 4  ;;  %v557_v59 = vmin.f32 %v251_v24, %v252_v38 }
  0xf2   :  { %v200_v60 = vrot.slane %v199_v39, 1  ;;  %v191_v62 = vrot.slane %v190_v48, 2  ;;  %v297_v63 = vrot.slane %v296_v50, 4  ;;  %v346_v52 = vmul.f32 %v504_v53, %v504_v53 }
  0xf3   :  { %v271_v0 = vrot.slane %v270_v55, 2  ;;  %v218_v1 = vmax.f32 %v216_v49, %v217_v58  ;;  %v174_v2 = vsel %vm166_vm1, %v508_v57, -inf  ;;  %v564_v3 = vsel %vm166_vm1, %v347_v46, 0.0 }
  0xf4   :  { %v192_v4 = vmax.f32 %v190_v48, %v191_v62  ;;  %v298_v5 = vmin.f32 %v296_v50, %v297_v63  ;;  %v175_v6 = vrot.slane %v174_v2, 4  ;;  %v280_v7 = vrot.slane %v279_v54, 1 }
  0xf5   :  { %v272_v8 = vmin.f32 %v270_v55, %v271_v0  ;;  %v325_v9 = vsel %vm166_vm1, %v504_v53, 0.0  ;;  %v254_v10 = vsel %vm166_vm1, %v508_v57, inf  ;;  %v219_v12 = vrot.slane %v218_v1, 2 }
  0xf6   :  { %v193_v11 = vrot.slane %v192_v4, 1  ;;  %v176_v13 = vmax.f32 %v174_v2, %v175_v6  ;;  %v255_v14 = vrot.slane %v254_v10, 4  ;;  %v201_v16 = vmax.f32 %v199_v39, %v200_v60 }
  0xf7   :  { %v356_v17 = vsel %vm166_vm1, %v346_v52, 0.0  ;;  %v573_v18 = vmul.f32 %v506_v56, %v506_v56  ;;  %v321_v20 = vsel %vm166_vm1, %v508_v57, 0.0  ;;  %v299_v53 = vrot.slane %v298_v5, 2 }
  0xf8   :  { %v177_v21 = vrot.slane %v176_v13, 2  ;;  %v256_v24 = vmin.f32 %v254_v10, %v255_v14  ;;  %v320_v25 = vsel %vm166_vm1, %v500_v47, 0.0  ;;  %v281_v26 = vmin.f32 %v279_v54, %v280_v7 }
  0xf9   :  { %v273_v27 = vrot.slane %v272_v8, 1  ;;  %v322_v29 = vadd.f32 %v321_v20, %v320_v25  ;;  %v344_v33 = vmul.f32 %v508_v57, %v508_v57  ;;  %v194_v35 = vmax.f32 %v192_v4, %v193_v11 }
  0xfa   :  { %v220_v36 = vmax.f32 %v218_v1, %v219_v12  ;;  %v178_v37 = vmax.f32 %v176_v13, %v177_v21  ;;  %v257_v38 = vrot.slane %v256_v24, 2  ;;  %v351_v40 = vsel %vm166_vm1, %v537_v32, 0.0 }
  0xfb   :  { %v324_v39 = vadd.f32 %v523_v22, %v322_v29  ;;  %v352_v41 = vsel %vm166_vm1, %v344_v33, 0.0  ;;  %v202_v47 = vsel %vm166_vm1, %v512_v61, -inf  ;;  %v300_v45 = vmin.f32 %v298_v5, %v299_v53 }
  0xfc   :  { %v179_v46 = vrot.slane %v178_v37, 1  ;;  %v258_v48 = vmin.f32 %v256_v24, %v257_v38  ;;  %v353_v49 = vadd.f32 %v352_v41, %v351_v40  ;;  %v274_v50 = vmin.f32 %v272_v8, %v273_v27 }
  0xfd   :  { %v203_v57 = vrot.slane %v202_v47, 4  ;;  %v282_v54 = vsel %vm166_vm1, %v512_v61, inf  ;;  %v326_v55 = vadd.f32 %v325_v9, %v324_v39  ;;  %v329_v0 = vsel %vm166_vm1, %v512_v61, 0.0 }
  0xfe   :  { %v180_v58 = vmax.f32 %v178_v37, %v179_v46  ;;  %v259_v22 = vrot.slane %v258_v48, 1  ;;  %v355_v60 = vadd.f32 %v526_v23, %v353_v49  ;;  %v283_v32 = vrot.slane %v282_v54, 4 }
  0xff   :  { %v204_v62 = vmax.f32 %v202_v47, %v203_v57  ;;  %v328_v63 = vadd.f32 %v549_v44, %v326_v55  ;;  %v348_v52 = vmul.f32 %v512_v61, %v512_v61  ;;  %v333_v13 = vsel %vm166_vm1, %v506_v56, 0.0 }
 0x100   :  { %v232_v1 = vsel %vm231_vm2, %v180_v58, %v555_v51  ;;  %v260_v2 = vmin.f32 %v258_v48, %v259_v22  ;;  %v284_v4 = vmin.f32 %v282_v54, %v283_v32  ;;  %v357_v5 = vadd.f32 %v356_v17, %v355_v60 }
 0x101   :  { %v234_v6 = vsel %vm233_vm3, %v544_v42, %v232_v1  ;;  %v205_v23 = vrot.slane %v204_v62, 2  ;;  %v330_v7 = vadd.f32 %v329_v0, %v328_v63  ;;  %v360_v8 = vsel %vm166_vm1, %v348_v52, 0.0 }
 0x102   :  { %v311_v44 = vsel %vm231_vm2, %v260_v2, %v557_v59  ;;  %v236_v9 = vsel %vm235_vm4, %v194_v35, %v234_v6  ;;  %v285_v10 = vrot.slane %v284_v4, 2  ;;  %v359_v61 = vadd.f32 %v564_v3, %v357_v5 }
 0x103   :  { %v312_v51 = vsel %vm233_vm3, %v546_v43, %v311_v44  ;;  %v206_v11 = vmax.f32 %v204_v62, %v205_v23  ;;  %v238_v12 = vsel %vm237_vm5, %v201_v16, %v236_v9  ;;  %v332_v42 = vadd.f32 %v529_v28, %v330_v7 }
 0x104   :  { %v286_v14 = vmin.f32 %v284_v4, %v285_v10  ;;  %v313_v17 = vsel %vm235_vm4, %v274_v50, %v312_v51  ;;  %v361_v59 = vadd.f32 %v360_v8, %v359_v61  ;;  %v221_v20 = vrot.slane %v220_v36, 1 }
 0x105   :  { %v207_v53 = vrot.slane %v206_v11, 1  ;;  %v314_v21 = vsel %vm237_vm5, %v281_v26, %v313_v17  ;;  %v334_v3 = vadd.f32 %v333_v13, %v332_v42  ;;  %v301_v24 = vrot.slane %v300_v45, 1 }
 0x106   :  { %v287_v43 = vrot.slane %v286_v14, 1  ;;  %v363_v25 = vadd.f32 %v533_v31, %v361_v59  ;;  %v364_v28 = vsel %vm166_vm1, %v573_v18, 0.0  ;;  %v215_v27 = vmax.f32 %v517_v15, %v214_v30 }
 0x107   :  { %v208_v16 = vmax.f32 %v206_v11, %v207_v53  ;;  %v335_v56 = vrot.slane %v334_v3, 4  ;;  %v295_v26 = vmin.f32 %v520_v19, %v294_v34  ;;  %v222_v35 = vmax.f32 %v220_v36, %v221_v20 }
 0x108   :  { %v288_v29 = vmin.f32 %v286_v14, %v287_v43  ;;  %v365_v33 = vadd.f32 %v364_v28, %v363_v25  ;;  %v302_v38 = vmin.f32 %v300_v45, %v301_v24 }
 0x109   :  { %v240_v31 = vsel %vm239_vm6, %v208_v16, %v238_v12  ;;  %v336_v37 = vadd.f32 %v335_v56, %v334_v3 }
 0x10a   :  { %v242_v18 = vsel %vm241_vm7, %v215_v27, %v240_v31  ;;  %v315_v39 = vsel %vm239_vm6, %v288_v29, %v314_v21  ;;  %v366_v40 = vrot.slane %v365_v33, 4 }
 0x10b   :  { %v244_v41 = vsel %vm243_vm8, %v222_v35, %v242_v18  ;;  %v316_v15 = vsel %vm241_vm7, %v295_v26, %v315_v39  ;;  %v337_v30 = vrot.slane %v336_v37, 2 }
 0x10c   :  { %246 = vst.msk [vmem:[%s645_s4] sm:$0xff] %vm166_vm1, %v244_v41  ;;  %v317_v19 = vsel %vm243_vm8, %v302_v38, %v316_v15  ;;  %v367_v34 = vadd.f32 %v366_v40, %v365_v33 }
 0x10d   :  { %319 = vst.msk [vmem:[%s646_s5] sm:$0xff] %vm166_vm1, %v317_v19  ;;  %v338_v36 = vadd.f32 %v337_v30, %v336_v37 }
 0x10e   :  { %v368_v47 = vrot.slane %v367_v34, 2 }
 0x10f   :  { %v339_v45 = vrot.slane %v338_v36, 1 }
 0x110   :  { %v369_v46 = vadd.f32 %v368_v47, %v367_v34 }
 0x111   :  { %v340_v48 = vadd.f32 %v339_v45, %v338_v36 }
 0x112   :  { %v370_v49 = vrot.slane %v369_v46, 1 }
 0x113   :  { %342 = vst.msk [vmem:[%s647_s6] sm:$0x1] %vm341_vm9, %v340_v48 }
 0x114   :  { %v371_v50 = vadd.f32 %v370_v49, %v369_v46 }
 0x116   :  { %372 = vst.msk [vmem:[%s648_s7] sm:$0x1] %vm341_vm9, %v371_v50 }

// kernel: _lambda_.2
= control target key start
LH: loop header
LB: loop body
LE: loop exit
PB: predicated region body
PF: predicated region fallthrough
CT: control target
= control target key end

     0   :  { %vm57_vm0 = vcmask 1043456   ;;  %vm44_vm1 = vcmask 64512   ;;  %vm158_vm2 = vcmask 125952   ;;  %vm167_vm3 = vcmask 130048   ;;  %s374_s1 = inlined_call_operand.vmem [shape: bf16[8,16], index: 1, kind: input, shape index: {}]   ;;  %s375_s0 = inlined_call_operand.vmem [shape: bf16[64,8], index: 0, kind: input, shape index: {}]   ;;  %s376_s2 = inlined_call_operand.vmem [shape: bf16[64,16], index: 2, kind: output, shape index: {0}]   ;;  %s377_s3 = inlined_call_operand.vmem [shape: f32[1,1,16], index: 3, kind: output, shape index: {1}]   ;;  %s378_s4 = inlined_call_operand.vmem [shape: f32[1,1,16], index: 4, kind: output, shape index: {2}]  }
   0x1   :  { %v23_v0 = vld [vmem:[%s374_s1] sm:$0xf]  ;;  %v277_v3 = vld [vmem:[%s375_s0 + $0x8] sm:$0xff]   ;;  %v278_v4 = vld [vmem:[%s375_s0 + $0x10] sm:$0xff]   ;;  %vm189_vm4 = vcmask 122880  }
   0x2   :  { %274 = vmatprep.subr.msk.bf16.mxu0 %vm57_vm0, %v23_v0  ;;  %v59_v1 = vsel %vm57_vm0, %v23_v0, 0  ;;  %v276_v2 = vld [vmem:[%s375_s0] sm:$0xff]   ;;  %275 = vmatprep.subr.msk.bf16.mxu1 %vm57_vm0, %v23_v0  ;;  %v279_v5 = vld [vmem:[%s375_s0 + $0x18] sm:$0xff]  }
   0x3   :  { %263 = vmatpush3.bf16.msra.mxu0 %v59_v1  ;;  %273 = vmatpush3.bf16.msra.mxu1 %v59_v1 }
   0x4   :  { %264 = vmatprep.mubr.msk.bf16.mxu0 %vm44_vm1, %v276_v2  ;;  %268 = vmatprep.mubr.msk.bf16.mxu1 %vm44_vm1, %v278_v4 }
   0x6   :  { %265 = vmatmul.mubr.msk.bf16.vlgmr.msra.gmra.mrb[0].mxu0 %vm44_vm1, %v277_v3  ;;  %269 = vmatmul.mubr.msk.bf16.vlgmr.msra.gmra.mrb[0].mxu1 %vm44_vm1, %v279_v5 }
  0xd9   :  { %v266_v6 = vpop.f32.mrb[0].mxu0  ;;  %v270_v9 = vpop.f32.mrb[0].mxu1 }
  0xda   :  { %v251_v7 = vpack.c.bf16 %v266_v6, %v266_v6  ;;  %v95_v8 = vpop.f32.mrb[1].mxu0  ;;  %v255_v13 = vpack.c.bf16 %v270_v9, %v270_v9  ;;  %v111_v14 = vpop.f32.mrb[1].mxu1  ;;  %v193_v15 = vmul.f32 %v266_v6, %v266_v6  ;;  %v171_v24 = vsel %vm167_vm3, %v266_v6, 0.0 }
  0xdb   :  { %v249_v10 = vpack.c.bf16 %v95_v8, %v95_v8  ;;  %v191_v11 = vmul.f32 %v95_v8, %v95_v8  ;;  %v267_v12 = vpop.f32.mrb[2].mxu0  ;;  %v271_v18 = vpop.f32.mrb[2].mxu1  ;;  %v168_v19 = vsel %vm167_vm3, %v95_v8, 0.0  ;;  %v253_v29 = vpack.c.bf16 %v111_v14, %v111_v14 }
  0xdc   :  { %161 = vst.msk [vmem:[%s376_s2 + $0x8] sm:$0xf] %vm158_vm2, %v251_v7  ;;  %v252_v16 = vpack.c.bf16 %v267_v12, %v267_v12  ;;  %v98_v17 = vpop.f32.mrb[3].mxu0  ;;  %165 = vst.msk [vmem:[%s376_s2 + $0x18] sm:$0xf] %vm158_vm2, %v255_v13  ;;  %v114_v23 = vpop.f32.mrb[3].mxu1  ;;  %v194_v25 = vmul.f32 %v267_v12, %v267_v12  ;;  %v195_v30 = vmul.f32 %v111_v14, %v111_v14 }
  0xdd   :  { %159 = vst.msk [vmem:[%s376_s2] sm:$0xf] %vm158_vm2, %v249_v10  ;;  %v250_v20 = vpack.c.bf16 %v98_v17, %v98_v17  ;;  %v169_v21 = vsel %vm167_vm3, %v98_v17, 0.0  ;;  %v192_v22 = vmul.f32 %v98_v17, %v98_v17  ;;  %v199_v27 = vsel %vm167_vm3, %v191_v11, 0.0  ;;  %163 = vst.msk [vmem:[%s376_s2 + $0x10] sm:$0xf] %vm158_vm2, %v253_v29 }
  0xde   :  { %162 = vst.msk [vmem:[%s376_s2 + $0xc] sm:$0xf] %vm158_vm2, %v252_v16  ;;  %v170_v26 = vadd.f32 %v169_v21, %v168_v19  ;;  %v256_v33 = vpack.c.bf16 %v271_v18, %v271_v18  ;;  %v202_v34 = vsel %vm167_vm3, %v193_v15, 0.0  ;;  %v173_v35 = vsel %vm167_vm3, %v267_v12, 0.0 }
  0xdf   :  { %160 = vst.msk [vmem:[%s376_s2 + $0x4] sm:$0xf] %vm158_vm2, %v250_v20  ;;  %v200_v28 = vsel %vm167_vm3, %v192_v22, 0.0  ;;  %v175_v36 = vsel %vm167_vm3, %v111_v14, 0.0  ;;  %v254_v37 = vpack.c.bf16 %v114_v23, %v114_v23  ;;  %v204_v40 = vsel %vm167_vm3, %v194_v25, 0.0 }
  0xe0   :  { %v172_v31 = vadd.f32 %v171_v24, %v170_v26  ;;  %v201_v32 = vadd.f32 %v200_v28, %v199_v27  ;;  %166 = vst.msk [vmem:[%s376_s2 + $0x1c] sm:$0xf] %vm158_vm2, %v256_v33  ;;  %v206_v41 = vsel %vm167_vm3, %v195_v30, 0.0  ;;  %v196_v42 = vmul.f32 %v114_v23, %v114_v23 }
  0xe1   :  { %164 = vst.msk [vmem:[%s376_s2 + $0x14] sm:$0xf] %vm158_vm2, %v254_v37  ;;  %v197_v45 = vmul.f32 %v270_v9, %v270_v9  ;;  %v177_v46 = vsel %vm167_vm3, %v114_v23, 0.0  ;;  %v179_v49 = vsel %vm167_vm3, %v270_v9, 0.0  ;;  %v198_v50 = vmul.f32 %v271_v18, %v271_v18 }
  0xe2   :  { %v203_v38 = vadd.f32 %v202_v34, %v201_v32  ;;  %v174_v39 = vadd.f32 %v173_v35, %v172_v31  ;;  %v208_v51 = vsel %vm167_vm3, %v196_v42, 0.0  ;;  %v181_v55 = vsel %vm167_vm3, %v271_v18, 0.0 }
  0xe3   :  { %v210_v54 = vsel %vm167_vm3, %v197_v45, 0.0  ;;  %v212_v58 = vsel %vm167_vm3, %v198_v50, 0.0 }
  0xe4   :  { %v176_v43 = vadd.f32 %v175_v36, %v174_v39  ;;  %v205_v44 = vadd.f32 %v204_v40, %v203_v38 }
  0xe6   :  { %v207_v47 = vadd.f32 %v206_v41, %v205_v44  ;;  %v178_v48 = vadd.f32 %v177_v46, %v176_v43 }
  0xe8   :  { %v180_v52 = vadd.f32 %v179_v49, %v178_v48  ;;  %v209_v53 = vadd.f32 %v208_v51, %v207_v47 }
  0xea   :  { %v182_v56 = vadd.f32 %v181_v55, %v180_v52  ;;  %v211_v57 = vadd.f32 %v210_v54, %v209_v53 }
  0xec   :  { %v183_v59 = vrot.slane %v182_v56, 4  ;;  %v213_v60 = vadd.f32 %v212_v58, %v211_v57 }
  0xee   :  { %v184_v61 = vadd.f32 %v183_v59, %v182_v56  ;;  %v214_v62 = vrot.slane %v213_v60, 4 }
  0xf0   :  { %v185_v63 = vrot.slane %v184_v61, 2  ;;  %v215_v0 = vadd.f32 %v214_v62, %v213_v60 }
  0xf2   :  { %v186_v1 = vadd.f32 %v185_v63, %v184_v61  ;;  %v216_v2 = vrot.slane %v215_v0, 2 }
  0xf4   :  { %v187_v3 = vrot.slane %v186_v1, 1  ;;  %v217_v4 = vadd.f32 %v216_v2, %v215_v0 }
  0xf6   :  { %v188_v5 = vadd.f32 %v187_v3, %v186_v1  ;;  %v218_v6 = vrot.slane %v217_v4, 1 }
  0xf8   :  { %190 = vst.msk [vmem:[%s377_s3] sm:$0x1] %vm189_vm4, %v188_v5  ;;  %v219_v7 = vadd.f32 %v218_v6, %v217_v4 }
  0xfa   :  { %220 = vst.msk [vmem:[%s378_s4] sm:$0x1] %vm189_vm4, %v219_v7 }

</bundles_post_ra>
